<compile_context>
chip_gen: v5e
topology: v5e:2x2
jax: 0.10.0
libtpu: 0.0.40
codegen_flags: <defaults>
</compile_context>

<pallas_src>
import functools

import jax
import jax.numpy as jnp
from jax import lax
from jax.experimental import pallas as pl
from jax.experimental.pallas import tpu as pltpu


def _round_up(v, m):
    return ((v + m - 1) // m) * m


def _sublane_quantum(dtype):
    # Native sublane packing: 8 rows for 4-byte, 16 for 2-byte, 32 for 1-byte.
    return max(8, 32 // jnp.dtype(dtype).itemsize)


# ---------------------------------------------------------------------------
# Fused path: the whole spatial extent (HW) of a row fits in one block.
# ---------------------------------------------------------------------------
def _inorm_fused_kernel(x_ref, scale_ref, shift_ref, o_ref, *, eps, hw):
    """x_ref/o_ref: (row_tile, HW); scale_ref/shift_ref: (row_tile, 1) f32."""
    x = x_ref[...].astype(jnp.float32)
    inv_n = 1.0 / float(hw)
    # Two-pass mean/variance: whole row is resident, so this is cheap and
    # avoids catastrophic cancellation of E[x^2] - mean^2.
    mean = jnp.sum(x, axis=1, keepdims=True) * inv_n
    d = x - mean
    var = jnp.sum(d * d, axis=1, keepdims=True) * inv_n
    rstd = lax.rsqrt(var + eps)
    a = rstd * scale_ref[...]                      # (row_tile, 1)
    o_ref[...] = (d * a + shift_ref[...]).astype(o_ref.dtype)


# ---------------------------------------------------------------------------
# Large-image path, pass 1: per-row sum / sum-of-squares across HW tiles.
# ---------------------------------------------------------------------------
def _inorm_stats_kernel(x_ref, mean_ref, rstd_ref, s1_ref, s2_ref, *,
                        eps, hw, hw_tile, needs_mask):
    j = pl.program_id(1)

    @pl.when(j == 0)
    def _():
        s1_ref[...] = jnp.zeros_like(s1_ref)
        s2_ref[...] = jnp.zeros_like(s2_ref)

    x = x_ref[...].astype(jnp.float32)
    if needs_mask:
        # Last HW tile extends past the array: OOB lanes hold garbage and MUST
        # be masked out of the reductions (jnp.where also blocks NaN/Inf).
        col = j * hw_tile + lax.broadcasted_iota(jnp.int32, x.shape, 1)
        x = jnp.where(col < hw, x, 0.0)

    s1_ref[...] += jnp.sum(x, axis=1, keepdims=True)
    s2_ref[...] += jnp.sum(x * x, axis=1, keepdims=True)

    @pl.when(j == pl.num_programs(1) - 1)
    def _():
        inv_n = 1.0 / float(hw)
        mean = s1_ref[...] * inv_n
        # TODO(synk): single-pass variance across tiles can lose precision when
        # |mean| >> std; a Welford/compensated merge would fix it if needed.
        var = jnp.maximum(s2_ref[...] * inv_n - mean * mean, 0.0)
        mean_ref[...] = mean
        rstd_ref[...] = lax.rsqrt(var + eps)


# ---------------------------------------------------------------------------
# Large-image path, pass 2: apply folded affine out = x*a + b.
# ---------------------------------------------------------------------------
def _inorm_apply_kernel(x_ref, mean_ref, rstd_ref, scale_ref, shift_ref, o_ref):
    a = rstd_ref[...] * scale_ref[...]
    b = shift_ref[...] - mean_ref[...] * a
    o_ref[...] = (x_ref[...].astype(jnp.float32) * a + b).astype(o_ref.dtype)


def instance_normalization(x, scale, shift, eps=1e-9, *, row_tile=None,
                           target_block_bytes=6 << 20, hw_split_bytes=1 << 20):
    """x: (N, C, H, W); scale, shift: (C,). Mirrors the PyTorch forward."""
    N, C, H, W = x.shape
    HW = H * W
    NC = N * C
    itemsize = jnp.dtype(x.dtype).itemsize
    sub = _sublane_quantum(x.dtype)
    hw_pad = _round_up(HW, 128)            # physical lane footprint of one row
    row_bytes = hw_pad * itemsize

    x2 = x.reshape(NC, HW)                 # contiguous view: no HBM pass
    # Per-row affine params (tiny; row index = n*C + c -> repeat scale N times).
    scale_rows = jnp.tile(scale.astype(jnp.float32), N).reshape(NC, 1)
    shift_rows = jnp.tile(shift.astype(jnp.float32), N).reshape(NC, 1)

    # Lane-padded VMEM cost of one (row, 1) f32 param block row.
    param_row_bytes = 128 * 4

    if row_bytes <= hw_split_bytes:
        # ---------------- fused single-kernel path ----------------
        if row_tile is None:
            rt = (target_block_bytes // (row_bytes + 2 * param_row_bytes))
            rt = (rt // sub) * sub
            rt = max(sub, int(rt))
        else:
            rt = _round_up(int(row_tile), sub)
        nc_sub = _round_up(NC, sub)
        rt = min(rt, nc_sub)
        if rt >= nc_sub and nc_sub >= 2 * sub:
            # Keep >= 2 grid steps so megacore parts can shard the grid.
            rt = _round_up((nc_sub + 1) // 2, sub)
        grid = (pl.cdiv(NC, rt),)

        # x + out double-buffered, plus lane-padded scale/shift blocks + slack.
        vmem_needed = 4 * rt * row_bytes + 4 * rt * param_row_bytes + (2 << 20)
        vmem_limit = int(min(max(vmem_needed, 16 << 20), 40 << 20))

        kernel = functools.partial(_inorm_fused_kernel, eps=float(eps), hw=HW)
        cost = pl.CostEstimate(flops=6 * NC * HW, transcendentals=NC,
                               bytes_accessed=2 * NC * HW * itemsize)
        out2 = pl.pallas_call(
            kernel,
            out_shape=jax.ShapeDtypeStruct((NC, HW), x.dtype),
            grid_spec=pltpu.PrefetchScalarGridSpec(
                num_scalar_prefetch=0,
                grid=grid,
                in_specs=[
                    # Last dim = full HW extent: legal even if HW % 128 != 0.
                    pl.BlockSpec((rt, HW), lambda i: (i, 0)),
                    pl.BlockSpec((rt, 1), lambda i: (i, 0)),
                    pl.BlockSpec((rt, 1), lambda i: (i, 0)),
                ],
                out_specs=pl.BlockSpec((rt, HW), lambda i: (i, 0)),
            ),
            compiler_params=pltpu.CompilerParams(
                dimension_semantics=("parallel",),
                vmem_limit_bytes=vmem_limit,
            ),
            cost_estimate=cost,
        )(x2, scale_rows, shift_rows)
        return out2.reshape(N, C, H, W)

    # ---------------- large-image path: split HW across a reduction axis ----
    rt = sub
    hw_tile = (target_block_bytes // (rt * itemsize)) // 128 * 128
    hw_tile = int(max(128, min(hw_tile, hw_pad)))
    n_row = pl.cdiv(NC, rt)
    n_hw = pl.cdiv(HW, hw_tile)
    block_bytes = rt * hw_tile * itemsize

    # Pass 1: accumulate s1/s2 in VMEM scratch; write mean/rstd on last tile.
    stats_kernel = functools.partial(
        _inorm_stats_kernel, eps=float(eps), hw=HW, hw_tile=hw_tile,
        needs_mask=(HW % hw_tile != 0))
    vmem_stats = int(min(max(2 * block_bytes + (2 << 20), 16 << 20), 40 << 20))
    mean_arr, rstd_arr = pl.pallas_call(
        stats_kernel,
        out_shape=(jax.ShapeDtypeStruct((NC, 1), jnp.float32),
                   jax.ShapeDtypeStruct((NC, 1), jnp.float32)),
        grid_spec=pltpu.PrefetchScalarGridSpec(
            num_scalar_prefetch=0,
            grid=(n_row, n_hw),
            in_specs=[pl.BlockSpec((rt, hw_tile), lambda i, j: (i, j))],
            out_specs=(pl.BlockSpec((rt, 1), lambda i, j: (i, 0)),
                       pl.BlockSpec((rt, 1), lambda i, j: (i, 0))),
            scratch_shapes=[pltpu.VMEM((rt, 1), jnp.float32),
                            pltpu.VMEM((rt, 1), jnp.float32)],
        ),
        compiler_params=pltpu.CompilerParams(
            dimension_semantics=("parallel", "arbitrary"),
            vmem_limit_bytes=vmem_stats,
        ),
        cost_estimate=pl.CostEstimate(flops=3 * NC * HW, transcendentals=NC,
                                      bytes_accessed=NC * HW * itemsize),
    )(x2)

    # Pass 2: normalize (mean/rstd/scale/shift blocks stay resident per row
    # tile since their block index is constant across the HW axis).
    vmem_apply = int(min(max(4 * block_bytes + (2 << 20), 16 << 20), 40 << 20))
    out2 = pl.pallas_call(
        _inorm_apply_kernel,
        out_shape=jax.ShapeDtypeStruct((NC, HW), x.dtype),
        grid_spec=pltpu.PrefetchScalarGridSpec(
            num_scalar_prefetch=0,
            grid=(n_row, n_hw),
            in_specs=[
                pl.BlockSpec((rt, hw_tile), lambda i, j: (i, j)),
                pl.BlockSpec((rt, 1), lambda i, j: (i, 0)),
                pl.BlockSpec((rt, 1), lambda i, j: (i, 0)),
                pl.BlockSpec((rt, 1), lambda i, j: (i, 0)),
                pl.BlockSpec((rt, 1), lambda i, j: (i, 0)),
            ],
            out_specs=pl.BlockSpec((rt, hw_tile), lambda i, j: (i, j)),
        ),
        compiler_params=pltpu.CompilerParams(
            dimension_semantics=("parallel", "parallel"),
            vmem_limit_bytes=vmem_apply,
        ),
        cost_estimate=pl.CostEstimate(flops=2 * NC * HW, transcendentals=0,
                                      bytes_accessed=2 * NC * HW * itemsize),
    )(x2, mean_arr, rstd_arr, scale_rows, shift_rows)
    return out2.reshape(N, C, H, W)


def _reference(x, scale, shift, eps=1e-9):
    # Pure-JAX reference mirroring the PyTorch forward
    # (torch.var(unbiased) * (n-1)/n == biased variance == jnp.var).
    N, C, H, W = x.shape
    t = x.reshape(N, C, H * W)
    mean = jnp.mean(t, axis=2)[..., None, None]
    var = jnp.var(t, axis=2)[..., None, None]
    out = (x - mean) / jnp.sqrt(var + eps)
    return out * scale[None, :, None, None] + shift[None, :, None, None]


if __name__ == "__main__":
    key = jax.random.PRNGKey(0)
    k_x, k_scale, k_x2, k_x3 = jax.random.split(key, 4)

    # Primary shape implied by the module: batch=2, channels=4, spatial 16x16.
    N, C, H, W = 2, 4, 16, 16
    x = jax.random.normal(k_x, (N, C, H, W), dtype=jnp.float32)
    # Deterministic parameter init matching the module: uniform scale, zero shift.
    scale = jax.random.uniform(k_scale, (C,), dtype=jnp.float32)
    shift = jnp.zeros((C,), dtype=jnp.float32)

    out = jax.block_until_ready(instance_normalization(x, scale, shift, eps=1e-9))
    ref = _reference(x, scale, shift, eps=1e-9)
    assert out.shape == (N, C, H, W)
    assert jnp.allclose(out, ref, atol=1e-5, rtol=1e-5), "fused path mismatch"

    # Ragged shape: HW not a multiple of 128 and N*C not a multiple of 8
    # (exercises the no-pad / full-extent-lane / partial-row-tile path).
    xb = jax.random.normal(k_x2, (1, 3, 10, 12), dtype=jnp.float32)
    sb = jax.random.uniform(k_scale, (3,), dtype=jnp.float32)
    bb = jnp.zeros((3,), dtype=jnp.float32)
    outb = jax.block_until_ready(instance_normalization(xb, sb, bb, eps=1e-9))
    assert jnp.allclose(outb, _reference(xb, sb, bb, eps=1e-9),
                        atol=1e-5, rtol=1e-5), "ragged fused path mismatch"

    # Force the large-image (HW-split, two-kernel) path with a ragged HW tail.
    xc = jax.random.normal(k_x3, (2, 4, 15, 20), dtype=jnp.float32)
    outc = jax.block_until_ready(
        instance_normalization(xc, scale, shift, eps=1e-9,
                               target_block_bytes=4096, hw_split_bytes=1))
    assert jnp.allclose(outc, _reference(xc, scale, shift, eps=1e-9),
                        atol=1e-5, rtol=1e-5), "HW-split path mismatch"

    print("KERNEL_OK")
</pallas_src>

<mosaic_0001>
module attributes {stable_mosaic.version = 11 : i64} {
  func.func @_inorm_fused_kernel(%arg0: i32, %arg1: memref<8x256xf32, #tpu.memory_space<vmem>>, %arg2: memref<8x1xf32, #tpu.memory_space<vmem>>, %arg3: memref<8x1xf32, #tpu.memory_space<vmem>>, %arg4: memref<8x256xf32, #tpu.memory_space<vmem>>) attributes {dimension_semantics = [#tpu.dimension_semantics<parallel>], iteration_bounds = array<i64: 1>, scalar_prefetch = 0 : i64, scratch_operands = 0 : i64, tpu.core_type = #tpu.core_type<tc>, window_params = [{transform_indices = @transform_0, window_bounds = array<i64: 8, 256>}, {transform_indices = @transform_1, window_bounds = array<i64: 8, 1>}, {transform_indices = @transform_2, window_bounds = array<i64: 8, 1>}, {transform_indices = @transform_3, window_bounds = array<i64: 8, 256>}]} {
    %c0 = arith.constant 0 : index
    %c0_0 = arith.constant 0 : index
    %0 = vector.load %arg1[%c0, %c0_0] : memref<8x256xf32, #tpu.memory_space<vmem>>, vector<8x256xf32>
    %cst = arith.constant dense<0.000000e+00> : vector<8xf32>
    %1 = vector.multi_reduction <add>, %0, %cst [1] : vector<8x256xf32> to vector<8xf32>
    %2 = vector.shape_cast %1 : vector<8xf32> to vector<8x1xf32>
    %cst_1 = arith.constant 3.906250e-03 : f32
    %3 = vector.broadcast %cst_1 : f32 to vector<8x1xf32>
    %4 = arith.mulf %2, %3 : vector<8x1xf32>
    %5 = vector.broadcast %4 : vector<8x1xf32> to vector<8x256xf32>
    %6 = arith.subf %0, %5 : vector<8x256xf32>
    %7 = arith.mulf %6, %6 : vector<8x256xf32>
    %cst_2 = arith.constant dense<0.000000e+00> : vector<8xf32>
    %8 = vector.multi_reduction <add>, %7, %cst_2 [1] : vector<8x256xf32> to vector<8xf32>
    %9 = vector.shape_cast %8 : vector<8xf32> to vector<8x1xf32>
    %cst_3 = arith.constant 3.906250e-03 : f32
    %10 = vector.broadcast %cst_3 : f32 to vector<8x1xf32>
    %11 = arith.mulf %9, %10 : vector<8x1xf32>
    %cst_4 = arith.constant 9.99999971E-10 : f32
    %12 = vector.broadcast %cst_4 : f32 to vector<8x1xf32>
    %13 = arith.addf %11, %12 : vector<8x1xf32>
    %14 = math.rsqrt %13 : vector<8x1xf32>
    %c0_5 = arith.constant 0 : index
    %c0_6 = arith.constant 0 : index
    %15 = vector.load %arg2[%c0_5, %c0_6] : memref<8x1xf32, #tpu.memory_space<vmem>>, vector<8x1xf32>
    %16 = arith.mulf %14, %15 : vector<8x1xf32>
    %17 = vector.broadcast %16 : vector<8x1xf32> to vector<8x256xf32>
    %18 = arith.mulf %6, %17 : vector<8x256xf32>
    %c0_7 = arith.constant 0 : index
    %c0_8 = arith.constant 0 : index
    %19 = vector.load %arg3[%c0_7, %c0_8] : memref<8x1xf32, #tpu.memory_space<vmem>>, vector<8x1xf32>
    %20 = vector.broadcast %19 : vector<8x1xf32> to vector<8x256xf32>
    %21 = arith.addf %18, %20 : vector<8x256xf32>
    %c0_9 = arith.constant 0 : index
    %c0_10 = arith.constant 0 : index
    %22 = vector.load %arg4[%c0_9, %c0_10] : memref<8x256xf32, #tpu.memory_space<vmem>>, vector<8x256xf32>
    tpu.vector_store %arg4[%c0_9, %c0_10], %21 {strides = array<i32>} : memref<8x256xf32, #tpu.memory_space<vmem>>, vector<8x256xf32>,
    return
  }
  func.func @transform_0(%arg0: i32) -> (i32, i32) {
    %c0_i32 = arith.constant 0 : i32
    %c0_i32_0 = arith.constant 0 : i32
    return %arg0, %c0_i32 : i32, i32
  }
  func.func @transform_1(%arg0: i32) -> (i32, i32) {
    %c0_i32 = arith.constant 0 : i32
    %c0_i32_0 = arith.constant 0 : i32
    return %arg0, %c0_i32 : i32, i32
  }
  func.func @transform_2(%arg0: i32) -> (i32, i32) {
    %c0_i32 = arith.constant 0 : i32
    %c0_i32_0 = arith.constant 0 : i32
    return %arg0, %c0_i32 : i32, i32
  }
  func.func @transform_3(%arg0: i32) -> (i32, i32) {
    %c0_i32 = arith.constant 0 : i32
    %c0_i32_0 = arith.constant 0 : i32
    return %arg0, %c0_i32 : i32, i32
  }
}

</mosaic_0001>

<bundles_post_ra>
// kernel: tpu_custom_call.1
= control target key start
LH: loop header
LB: loop body
LE: loop exit
PB: predicated region body
PF: predicated region fallthrough
CT: control target
= control target key end

     0   :  { %s144_s0 = inlined_call_operand.vmem [shape: f32[8,256], index: 0, kind: input, shape index: {}]   ;;  %s145_s1 = inlined_call_operand.vmem [shape: f32[8,1], index: 1, kind: input, shape index: {}]   ;;  %s146_s2 = inlined_call_operand.vmem [shape: f32[8,1], index: 2, kind: input, shape index: {}]   ;;  %s147_s3 = inlined_call_operand.hbm [shape: f32[8,256], index: 3, kind: output, shape index: {}]  }
   0x1   :  { %v15_v0 = vld [vmem:[%s144_s0] sm:$0xff]  ;;  %v16_v1 = vld [vmem:[%s144_s0 + $0x8] sm:$0xff] }
   0x2   :  { %8 = vsyncpa [#allocation3], 0  ;;  %v17_v2 = vadd.f32 %v16_v1, %v15_v0  ;;  %v107_v10 = vmov 0   ;;  %v40_v20 = vld [vmem:[%s145_s1] sm:$0xff]  ;;  %s108_s19 = smov [#allocation2]   ;;  %s66_s23 = sshll.u32 %s147_s3, 4  ;;  %s67_s23 = int_to_ptr.hbm [resolvable:$true] %s66_s23 }
   0x3   :  { %77 = vset.pattern.permute.xlu1 %v107_v10  ;;  %78 = vset.pattern.permute.xlu0 %v107_v10  ;;  %v49_v23 = vld [vmem:[%s146_s2] sm:$0xff]  ;;  %s64_s20 = sshll.u32 %s108_s19, 4  ;;  %s65_s20 = int_to_ptr.vmem [resolvable:$true] %s64_s20 }
   0x4   :  { %18 = vadd.xlane.f32.xlu0 %v17_v2 }
  0x77   :  { %v19_v3 = vpop.xlane.xlu0 %18 }
  0x78   :  { %v20_v4 = vmul.f32 0.00390625, %v19_v3 }
  0x7a   :  { %v21_v5 = vsub.f32 %v15_v0, %v20_v4  ;;  %v22_v6 = vsub.f32 %v16_v1, %v20_v4 }
  0x7c   :  { %v23_v7 = vmul.f32 %v21_v5, %v21_v5  ;;  %v24_v8 = vmul.f32 %v22_v6, %v22_v6 }
  0x7e   :  { %v25_v9 = vadd.f32 %v24_v8, %v23_v7 }
  0x80   :  { %26 = vadd.xlane.f32.xlu0 %v25_v9 }
  0xf3   :  { %v27_v11 = vpop.xlane.xlu0 %26 }
  0xf4   :  { %v28_v12 = vmul.f32 0.00390625, %v27_v11 }
  0xf6   :  { %v29_v13 = vadd.f32 1e-09, %v28_v12 }
  0xf8   :  { %79 = vrsqrt.f32 %v29_v13  ;;  %vm36_vm1 = vweird.f32 %v29_v13 }
  0xfe   :  { %v80_v14 = vpop.eup %79 }
  0xff   :  { %v31_v15 = vmul.f32 %v80_v14, %v29_v13  ;;  %vm37_vm0 = vweird.f32 %v80_v14 }
 0x100   :  { %vm38_vm2 = vmor %vm36_vm1, %vm37_vm0 }
 0x101   :  { %v32_v16 = vmul.f32 %v80_v14, %v31_v15 }
 0x103   :  { %v33_v17 = vmul.f32 0.5, %v32_v16 }
 0x105   :  { %v34_v18 = vsub.f32 1.5, %v33_v17 }
 0x107   :  { %v35_v19 = vmul.f32 %v80_v14, %v34_v18 }
 0x109   :  { %v39_v21 = vsel %vm38_vm2, %v80_v14, %v35_v19 }
 0x10a   :  { %v41_v22 = vmul.f32 %v40_v20, %v39_v21 }
 0x10c   :  { %44 = vperm.xlu1 %77, %v41_v22  }
 0x114   :  { %52 = vperm.xlu1 %77, %v49_v23  }
 0x17e   :  { %v45_v24 = vpop.permute.xlu1 %44 }
 0x17f   :  { %v47_v25 = vmul.f32 %v45_v24, %v21_v5  ;;  %v48_v26 = vmul.f32 %v45_v24, %v22_v6 }
 0x186   :  { %v53_v27 = vpop.permute.xlu1 %52 }
 0x187   :  { %v55_v28 = vadd.f32 %v53_v27, %v47_v25  ;;  %v56_v29 = vadd.f32 %v53_v27, %v48_v26 }
 0x189   :  { %57 = vst [vmem:[#allocation2] sm:$0xff] %v55_v28 }
 0x18a   :  { %58 = vst [vmem:[#allocation2 + $0x8] sm:$0xff] %v56_v29 }
 0x18b   :  { %69 = dma.vmem_to_hbm [thread:$0]  %s65_s20, 256, %s67_s23, [#allocation3]  }
 0x18c   :  { %105 = dma.done.wait [#allocation3], 256  }
 0x18d   :  { %106 = vsyncadd [#allocation3], 4294967040 }
 0x18e   :  { %74 = vsyncpa [#allocation3], 1 }

</bundles_post_ra>
